<compile_context>
chip_gen: v7x
topology: tpu7x:2x2x1
jax: 0.10.0
libtpu: 0.0.40
codegen_flags: <defaults>
</compile_context>

<pallas_src>
import functools
import math

import jax
import jax.numpy as jnp
from jax.experimental import pallas as pl
from jax.experimental.pallas import tpu as pltpu  # noqa: F401

EMB = 32            # embedding_dimension (small synthetic size)
N_CAT = 4
N_NUM = 5
DES_SIZE = 64
TWEET_SIZE = 64
N_USER = 16
LEAKY_SLOPE = 0.01  # nn.LeakyReLU default
PAD_OUT = 128       # lane-dense classifier output slab (real logits = 2)
NEG_BIG = -1e30     # additive "no edge" bias (f32-safe sentinel)


def _leaky(y):
    return jnp.where(y > 0, y, LEAKY_SLOPE * y)


def _full_spec(shape):
    return pl.BlockSpec(shape, lambda i: (0, 0))


# ----------------------------------------------------------------------------
# Fused Pallas kernels
# ----------------------------------------------------------------------------
def _user_fused_kernel(xpn_ref, wpn_ref, bpn_ref,
                       wprop_ref, bprop_ref,
                       wpout_ref, bpout_ref,
                       wqkv_ref, bqkv_ref,
                       bias_f_ref, bias_r_ref,
                       gate_ref,
                       wout_ref, bout_ref,
                       wc1_ref, bc1_ref,
                       wc2_ref, bc2_ref,
                       o_ref):
    f32 = jnp.float32
    d = EMB

    # ---- PropertyVector (cat/num merged via block-diagonal weight) ----
    h = _leaky(jnp.dot(xpn_ref[...], wpn_ref[...],
                       preferred_element_type=f32) + bpn_ref[...])
    h = _leaky(jnp.dot(h, wprop_ref[...],
                       preferred_element_type=f32) + bprop_ref[...])
    x = _leaky(jnp.dot(h, wpout_ref[...],
                       preferred_element_type=f32) + bpout_ref[...])      # (N, EMB)

    # ---- HGTConv (heads=1); relation transforms pre-folded into wqkv ----
    kqv = jnp.dot(x, wqkv_ref[...], preferred_element_type=f32) + bqkv_ref[...]
    q = kqv[:, 0 * d:1 * d]
    k_f = kqv[:, 1 * d:2 * d]       # already scaled by p_follow / sqrt(d)
    k_r = kqv[:, 2 * d:3 * d]       # already scaled by p_friend / sqrt(d)
    v_f = kqv[:, 3 * d:4 * d]
    v_r = kqv[:, 4 * d:5 * d]

    s_f = jnp.dot(q, k_f.T, preferred_element_type=f32) + bias_f_ref[...]
    s_r = jnp.dot(q, k_r.T, preferred_element_type=f32) + bias_r_ref[...]

    # joint softmax over both relation blocks (no concat needed)
    m = jnp.maximum(jnp.max(s_f, axis=-1, keepdims=True),
                    jnp.max(s_r, axis=-1, keepdims=True))
    row_valid = m > jnp.float32(-1e29)           # node has >=1 in-edge
    m_safe = jnp.where(row_valid, m, 0.0)
    e_f = jnp.exp(s_f - m_safe)                  # -1e30 entries underflow to 0
    e_r = jnp.exp(s_r - m_safe)
    denom = (jnp.sum(e_f, axis=-1, keepdims=True)
             + jnp.sum(e_r, axis=-1, keepdims=True))
    inv = pl.reciprocal(jnp.maximum(denom, 1e-30), approx=True)
    msg = (jnp.dot(e_f, v_f, preferred_element_type=f32)
           + jnp.dot(e_r, v_r, preferred_element_type=f32)) * inv
    msg = jnp.where(row_valid, msg, 0.0)         # isolated nodes -> zero message

    # ---- output transform + gated skip ----
    # TODO(synk): PyG uses exact erf-GELU; tanh approximation used for safe lowering.
    hm = jax.nn.gelu(msg, approximate=True)
    y = jnp.dot(hm, wout_ref[...], preferred_element_type=f32) + bout_ref[...]
    gate = gate_ref[...]                         # (1,1) broadcast
    node = gate * y + (1.0 - gate) * x

    # ---- classifier (lane-dense padded output slab) ----
    c = _leaky(jnp.dot(node, wc1_ref[...],
                       preferred_element_type=f32) + bc1_ref[...])
    o_ref[...] = (jnp.dot(c, wc2_ref[...],
                          preferred_element_type=f32) + bc2_ref[...]).astype(o_ref.dtype)


def _tweet_fused_kernel(text_ref, wt_ref, bt_ref,
                        wc1_ref, bc1_ref, wc2_ref, bc2_ref, o_ref):
    f32 = jnp.float32
    node = _leaky(jnp.dot(text_ref[...], wt_ref[...],
                          preferred_element_type=f32) + bt_ref[...])
    # TODO(synk): original passes {'tweet': node} into HGTConv whose 'post' edges need
    # missing 'user' features (crashes in the reference); HGT step skipped here.
    c = _leaky(jnp.dot(node, wc1_ref[...],
                       preferred_element_type=f32) + bc1_ref[...])
    o_ref[...] = (jnp.dot(c, wc2_ref[...],
                          preferred_element_type=f32) + bc2_ref[...]).astype(o_ref.dtype)


# ----------------------------------------------------------------------------
# Parameter construction (deterministic, synthetic)
# ----------------------------------------------------------------------------
def _init_linear(key, fan_in, fan_out):
    kw, kb = jax.random.split(key)
    bound = 1.0 / math.sqrt(fan_in)
    w = jax.random.uniform(kw, (fan_in, fan_out), jnp.float32, -bound, bound)
    b = jax.random.uniform(kb, (fan_out,), jnp.float32, -bound, bound)
    return w, b


def make_params(key):
    keys = jax.random.split(key, 16)
    p = {}
    # PropertyVector
    p["W_cat"], p["b_cat"] = _init_linear(keys[0], N_CAT, EMB // 4)
    p["W_num"], p["b_num"] = _init_linear(keys[1], N_NUM, EMB // 4)
    p["W_prop"], p["b_prop"] = _init_linear(keys[2], EMB // 2, EMB // 2)
    # TODO(synk): reference declares out_layer = Linear(emb, emb) but feeds it an
    # emb/2-dim vector (shape bug); implemented as Linear(emb/2, emb).
    p["W_pout"], p["b_pout"] = _init_linear(keys[3], EMB // 2, EMB)
    # TweetVector
    p["W_tweet"], p["b_tweet"] = _init_linear(keys[4], TWEET_SIZE, EMB)
    # HGTConv (heads=1, in=out=EMB)
    p["W_kqv_user"], p["b_kqv_user"] = _init_linear(keys[5], EMB, 3 * EMB)
    p["W_kqv_tweet"], p["b_kqv_tweet"] = _init_linear(keys[6], EMB, 3 * EMB)
    p["W_out_user"], p["b_out_user"] = _init_linear(keys[7], EMB, EMB)
    p["W_out_tweet"], p["b_out_tweet"] = _init_linear(keys[8], EMB, EMB)
    for i, rel in enumerate(["follow", "friend", "post"]):
        p[f"a_rel_{rel}"], _ = _init_linear(keys[9 + i], EMB, EMB)   # no bias in PyG
        p[f"m_rel_{rel}"], _ = _init_linear(keys[12 + i], EMB, EMB)  # no bias in PyG
        p[f"p_rel_{rel}"] = 1.0   # PyG init: ones
    p["skip_user"] = 1.0          # PyG init: ones
    p["skip_tweet"] = 1.0
    # classify_layer
    p["W_c1"], p["b_c1"] = _init_linear(keys[15], EMB, EMB)
    p["W_c2"], p["b_c2"] = _init_linear(jax.random.fold_in(key, 99), EMB, 2)
    return p


# ----------------------------------------------------------------------------
# Forward wrappers (weight folding in plain JAX, hot path = one Pallas kernel)
# ----------------------------------------------------------------------------
def adj_bias(edge_index, n):
    """Additive attention bias: 0.0 where an edge dst<-src exists, -1e30 elsewhere."""
    src, dst = edge_index[0], edge_index[1]
    b = jnp.full((n, n), NEG_BIG, jnp.float32)
    return b.at[dst, src].set(0.0)


def _padded_classifier_head(params):
    w_c2 = jnp.zeros((EMB, PAD_OUT), jnp.float32).at[:, :2].set(params["W_c2"])
    b_c2 = jnp.zeros((PAD_OUT,), jnp.float32).at[:2].set(params["b_c2"])
    return w_c2, b_c2


@jax.jit
def user_forward(params, cat_prop, num_prop, bias_follow, bias_friend):
    n = cat_prop.shape[0]
    d = EMB

    # merged cat/num property projection (block-diagonal weight)
    w_pn = jnp.zeros((N_CAT + N_NUM, EMB // 2), jnp.float32)
    w_pn = w_pn.at[:N_CAT, :EMB // 4].set(params["W_cat"])
    w_pn = w_pn.at[N_CAT:, EMB // 4:].set(params["W_num"])
    b_pn = jnp.concatenate([params["b_cat"], params["b_num"]])
    x_pn = jnp.concatenate([cat_prop, num_prop], axis=1)            # (N, 9)

    # fold relation transforms + scaling into one (EMB, 5*EMB) KQV weight
    wk = params["W_kqv_user"][:, :d]
    wq = params["W_kqv_user"][:, d:2 * d]
    wv = params["W_kqv_user"][:, 2 * d:]
    bk = params["b_kqv_user"][:d]
    bq = params["b_kqv_user"][d:2 * d]
    bv = params["b_kqv_user"][2 * d:]
    scale = 1.0 / math.sqrt(d)
    sf = params["p_rel_follow"] * scale
    sr = params["p_rel_friend"] * scale
    w_comb = jnp.concatenate([
        wq,
        (wk @ params["a_rel_follow"]) * sf,
        (wk @ params["a_rel_friend"]) * sr,
        wv @ params["m_rel_follow"],
        wv @ params["m_rel_friend"],
    ], axis=1)                                                       # (EMB, 160)
    b_comb = jnp.concatenate([
        bq,
        (bk @ params["a_rel_follow"]) * sf,
        (bk @ params["a_rel_friend"]) * sr,
        bv @ params["m_rel_follow"],
        bv @ params["m_rel_friend"],
    ])                                                               # (160,)

    w_c2, b_c2 = _padded_classifier_head(params)
    gate = jax.nn.sigmoid(jnp.asarray(params["skip_user"], jnp.float32)).reshape(1, 1)

    inputs = [
        x_pn, w_pn, b_pn.reshape(1, -1),
        params["W_prop"], params["b_prop"].reshape(1, -1),
        params["W_pout"], params["b_pout"].reshape(1, -1),
        w_comb, b_comb.reshape(1, -1),
        bias_follow, bias_friend,
        gate,
        params["W_out_user"], params["b_out_user"].reshape(1, -1),
        params["W_c1"], params["b_c1"].reshape(1, -1),
        w_c2, b_c2.reshape(1, -1),
    ]
    out_pad = pl.pallas_call(
        _user_fused_kernel,
        out_shape=jax.ShapeDtypeStruct((n, PAD_OUT), jnp.float32),
        grid=(1,),
        in_specs=[_full_spec(a.shape) for a in inputs],
        out_specs=_full_spec((n, PAD_OUT)),
    )(*inputs)
    return out_pad[:, :2]


@jax.jit
def tweet_forward(params, text):
    n = text.shape[0]
    w_c2, b_c2 = _padded_classifier_head(params)
    inputs = [
        text, params["W_tweet"], params["b_tweet"].reshape(1, -1),
        params["W_c1"], params["b_c1"].reshape(1, -1),
        w_c2, b_c2.reshape(1, -1),
    ]
    out_pad = pl.pallas_call(
        _tweet_fused_kernel,
        out_shape=jax.ShapeDtypeStruct((n, PAD_OUT), jnp.float32),
        grid=(1,),
        in_specs=[_full_spec(a.shape) for a in inputs],
        out_specs=_full_spec((n, PAD_OUT)),
    )(*inputs)
    return out_pad[:, :2]


def hgt_detector_forward(params, node_type, cat_prop, num_prop, des, text,
                         follow_edge_index, friend_edge_index):
    # NOTE: `des` is unused, matching the reference PropertyVector.forward.
    if node_type == 0:
        n = cat_prop.shape[0]
        bias_follow = adj_bias(follow_edge_index, n)
        bias_friend = adj_bias(friend_edge_index, n)
        return user_forward(params, cat_prop, num_prop, bias_follow, bias_friend)
    else:
        return tweet_forward(params, text)


# ----------------------------------------------------------------------------
# Main
# ----------------------------------------------------------------------------
if __name__ == "__main__":
    key = jax.random.PRNGKey(0)
    k_in, k_params = jax.random.split(key)
    k1, k2, k3, k4 = jax.random.split(k_in, 4)

    cat_prop = jax.random.normal(k1, (N_USER, N_CAT), jnp.float32)
    num_prop = jax.random.normal(k2, (N_USER, N_NUM), jnp.float32)
    des = jax.random.normal(k3, (N_USER, DES_SIZE), jnp.float32)
    text = jax.random.normal(k4, (N_USER, TWEET_SIZE), jnp.float32)

    # TODO(synk): original loads edge_index.pt / edge_type.pt from disk; synthesize a
    # deterministic ring graph instead (each user has one 'follow' and one 'friend' in-edge).
    idx = jnp.arange(N_USER)
    follow_edge_index = jnp.stack([(idx + 1) % N_USER, idx])   # [2, E] (src, dst)
    friend_edge_index = jnp.stack([(idx + 3) % N_USER, idx])

    params = make_params(k_params)

    out = hgt_detector_forward(params, 0, cat_prop, num_prop, des, text,
                               follow_edge_index, friend_edge_index)
    out = jax.block_until_ready(out)
    assert out.shape == (N_USER, 2)
    assert bool(jnp.all(jnp.isfinite(out)))
    print("KERNEL_OK")
</pallas_src>

<mosaic_0001>
module attributes {stable_mosaic.version = 11 : i64} {
  func.func @_user_fused_kernel(%arg0: i32, %arg1: memref<16x9xf32, #tpu.memory_space<vmem>>, %arg2: memref<9x16xf32, #tpu.memory_space<vmem>>, %arg3: memref<1x16xf32, #tpu.memory_space<vmem>>, %arg4: memref<16x16xf32, #tpu.memory_space<vmem>>, %arg5: memref<1x16xf32, #tpu.memory_space<vmem>>, %arg6: memref<16x32xf32, #tpu.memory_space<vmem>>, %arg7: memref<1x32xf32, #tpu.memory_space<vmem>>, %arg8: memref<32x160xf32, #tpu.memory_space<vmem>>, %arg9: memref<1x160xf32, #tpu.memory_space<vmem>>, %arg10: memref<16x16xf32, #tpu.memory_space<vmem>>, %arg11: memref<16x16xf32, #tpu.memory_space<vmem>>, %arg12: memref<1x1xf32, #tpu.memory_space<vmem>>, %arg13: memref<32x32xf32, #tpu.memory_space<vmem>>, %arg14: memref<1x32xf32, #tpu.memory_space<vmem>>, %arg15: memref<32x32xf32, #tpu.memory_space<vmem>>, %arg16: memref<1x32xf32, #tpu.memory_space<vmem>>, %arg17: memref<32x128xf32, #tpu.memory_space<vmem>>, %arg18: memref<1x128xf32, #tpu.memory_space<vmem>>, %arg19: memref<16x128xf32, #tpu.memory_space<vmem>>) attributes {dimension_semantics = [#tpu.dimension_semantics<arbitrary>], iteration_bounds = array<i64: 1>, scalar_prefetch = 0 : i64, scratch_operands = 0 : i64, tpu.core_type = #tpu.core_type<tc>, window_params = [{pipeline_mode = #tpu.pipeline_mode<synchronous>, transform_indices = @transform_0, window_bounds = array<i64: 16, 9>}, {pipeline_mode = #tpu.pipeline_mode<synchronous>, transform_indices = @transform_1, window_bounds = array<i64: 9, 16>}, {pipeline_mode = #tpu.pipeline_mode<synchronous>, transform_indices = @transform_2, window_bounds = array<i64: 1, 16>}, {pipeline_mode = #tpu.pipeline_mode<synchronous>, transform_indices = @transform_3, window_bounds = array<i64: 16, 16>}, {pipeline_mode = #tpu.pipeline_mode<synchronous>, transform_indices = @transform_4, window_bounds = array<i64: 1, 16>}, {pipeline_mode = #tpu.pipeline_mode<synchronous>, transform_indices = @transform_5, window_bounds = array<i64: 16, 32>}, {pipeline_mode = #tpu.pipeline_mode<synchronous>, transform_indices = @transform_6, window_bounds = array<i64: 1, 32>}, {pipeline_mode = #tpu.pipeline_mode<synchronous>, transform_indices = @transform_7, window_bounds = array<i64: 32, 160>}, {pipeline_mode = #tpu.pipeline_mode<synchronous>, transform_indices = @transform_8, window_bounds = array<i64: 1, 160>}, {pipeline_mode = #tpu.pipeline_mode<synchronous>, transform_indices = @transform_9, window_bounds = array<i64: 16, 16>}, {pipeline_mode = #tpu.pipeline_mode<synchronous>, transform_indices = @transform_10, window_bounds = array<i64: 16, 16>}, {pipeline_mode = #tpu.pipeline_mode<synchronous>, transform_indices = @transform_11, window_bounds = array<i64: 1, 1>}, {pipeline_mode = #tpu.pipeline_mode<synchronous>, transform_indices = @transform_12, window_bounds = array<i64: 32, 32>}, {pipeline_mode = #tpu.pipeline_mode<synchronous>, transform_indices = @transform_13, window_bounds = array<i64: 1, 32>}, {pipeline_mode = #tpu.pipeline_mode<synchronous>, transform_indices = @transform_14, window_bounds = array<i64: 32, 32>}, {pipeline_mode = #tpu.pipeline_mode<synchronous>, transform_indices = @transform_15, window_bounds = array<i64: 1, 32>}, {pipeline_mode = #tpu.pipeline_mode<synchronous>, transform_indices = @transform_16, window_bounds = array<i64: 32, 128>}, {pipeline_mode = #tpu.pipeline_mode<synchronous>, transform_indices = @transform_17, window_bounds = array<i64: 1, 128>}, {pipeline_mode = #tpu.pipeline_mode<synchronous>, transform_indices = @transform_18, window_bounds = array<i64: 16, 128>}]} {
    %c0 = arith.constant 0 : index
    %c0_0 = arith.constant 0 : index
    %0 = vector.load %arg1[%c0, %c0_0] : memref<16x9xf32, #tpu.memory_space<vmem>>, vector<16x9xf32>
    %c0_1 = arith.constant 0 : index
    %c0_2 = arith.constant 0 : index
    %1 = vector.load %arg2[%c0_1, %c0_2] : memref<9x16xf32, #tpu.memory_space<vmem>>, vector<9x16xf32>
    %cst = arith.constant dense<0.000000e+00> : vector<16x16xf32>
    %2 = tpu.matmul %0, %1, %cst {dimension_numbers = #tpu.dot_dimension_numbers<[1], [0], [0], [1], [0, 0, 1, 1], [], []>} : vector<16x9xf32>, vector<9x16xf32>, vector<16x16xf32> -> vector<16x16xf32>
    %c0_3 = arith.constant 0 : index
    %c0_4 = arith.constant 0 : index
    %3 = vector.load %arg3[%c0_3, %c0_4] : memref<1x16xf32, #tpu.memory_space<vmem>>, vector<1x16xf32>
    %4 = vector.broadcast %3 : vector<1x16xf32> to vector<16x16xf32>
    %5 = arith.addf %2, %4 : vector<16x16xf32>
    %cst_5 = arith.constant 0.000000e+00 : f32
    %6 = vector.broadcast %cst_5 : f32 to vector<16x16xf32>
    %7 = arith.cmpf ogt, %5, %6 : vector<16x16xf32>
    %cst_6 = arith.constant 0.00999999977 : f32
    %8 = vector.broadcast %cst_6 : f32 to vector<16x16xf32>
    %9 = arith.mulf %8, %5 : vector<16x16xf32>
    %10 = arith.select %7, %5, %9 : vector<16x16xi1>, vector<16x16xf32>
    %c0_7 = arith.constant 0 : index
    %c0_8 = arith.constant 0 : index
    %11 = vector.load %arg4[%c0_7, %c0_8] : memref<16x16xf32, #tpu.memory_space<vmem>>, vector<16x16xf32>
    %cst_9 = arith.constant dense<0.000000e+00> : vector<16x16xf32>
    %12 = tpu.matmul %10, %11, %cst_9 {dimension_numbers = #tpu.dot_dimension_numbers<[1], [0], [0], [1], [0, 0, 1, 1], [], []>} : vector<16x16xf32>, vector<16x16xf32>, vector<16x16xf32> -> vector<16x16xf32>
    %c0_10 = arith.constant 0 : index
    %c0_11 = arith.constant 0 : index
    %13 = vector.load %arg5[%c0_10, %c0_11] : memref<1x16xf32, #tpu.memory_space<vmem>>, vector<1x16xf32>
    %14 = vector.broadcast %13 : vector<1x16xf32> to vector<16x16xf32>
    %15 = arith.addf %12, %14 : vector<16x16xf32>
    %cst_12 = arith.constant 0.000000e+00 : f32
    %16 = vector.broadcast %cst_12 : f32 to vector<16x16xf32>
    %17 = arith.cmpf ogt, %15, %16 : vector<16x16xf32>
    %cst_13 = arith.constant 0.00999999977 : f32
    %18 = vector.broadcast %cst_13 : f32 to vector<16x16xf32>
    %19 = arith.mulf %18, %15 : vector<16x16xf32>
    %20 = arith.select %17, %15, %19 : vector<16x16xi1>, vector<16x16xf32>
    %c0_14 = arith.constant 0 : index
    %c0_15 = arith.constant 0 : index
    %21 = vector.load %arg6[%c0_14, %c0_15] : memref<16x32xf32, #tpu.memory_space<vmem>>, vector<16x32xf32>
    %cst_16 = arith.constant dense<0.000000e+00> : vector<16x32xf32>
    %22 = tpu.matmul %20, %21, %cst_16 {dimension_numbers = #tpu.dot_dimension_numbers<[1], [0], [0], [1], [0, 0, 1, 1], [], []>} : vector<16x16xf32>, vector<16x32xf32>, vector<16x32xf32> -> vector<16x32xf32>
    %c0_17 = arith.constant 0 : index
    %c0_18 = arith.constant 0 : index
    %23 = vector.load %arg7[%c0_17, %c0_18] : memref<1x32xf32, #tpu.memory_space<vmem>>, vector<1x32xf32>
    %24 = vector.broadcast %23 : vector<1x32xf32> to vector<16x32xf32>
    %25 = arith.addf %22, %24 : vector<16x32xf32>
    %cst_19 = arith.constant 0.000000e+00 : f32
    %26 = vector.broadcast %cst_19 : f32 to vector<16x32xf32>
    %27 = arith.cmpf ogt, %25, %26 : vector<16x32xf32>
    %cst_20 = arith.constant 0.00999999977 : f32
    %28 = vector.broadcast %cst_20 : f32 to vector<16x32xf32>
    %29 = arith.mulf %28, %25 : vector<16x32xf32>
    %30 = arith.select %27, %25, %29 : vector<16x32xi1>, vector<16x32xf32>
    %c0_21 = arith.constant 0 : index
    %c0_22 = arith.constant 0 : index
    %31 = vector.load %arg8[%c0_21, %c0_22] : memref<32x160xf32, #tpu.memory_space<vmem>>, vector<32x160xf32>
    %cst_23 = arith.constant dense<0.000000e+00> : vector<16x160xf32>
    %32 = tpu.matmul %30, %31, %cst_23 {dimension_numbers = #tpu.dot_dimension_numbers<[1], [0], [0], [1], [0, 0, 1, 1], [], []>} : vector<16x32xf32>, vector<32x160xf32>, vector<16x160xf32> -> vector<16x160xf32>
    %c0_24 = arith.constant 0 : index
    %c0_25 = arith.constant 0 : index
    %33 = vector.load %arg9[%c0_24, %c0_25] : memref<1x160xf32, #tpu.memory_space<vmem>>, vector<1x160xf32>
    %34 = vector.broadcast %33 : vector<1x160xf32> to vector<16x160xf32>
    %35 = arith.addf %32, %34 : vector<16x160xf32>
    %36 = vector.extract_strided_slice %35 {offsets = [0, 0], sizes = [16, 32], strides = [1, 1]} : vector<16x160xf32> to vector<16x32xf32>
    %37 = vector.extract_strided_slice %35 {offsets = [0, 32], sizes = [16, 32], strides = [1, 1]} : vector<16x160xf32> to vector<16x32xf32>
    %38 = vector.extract_strided_slice %35 {offsets = [0, 64], sizes = [16, 32], strides = [1, 1]} : vector<16x160xf32> to vector<16x32xf32>
    %39 = vector.extract_strided_slice %35 {offsets = [0, 96], sizes = [16, 32], strides = [1, 1]} : vector<16x160xf32> to vector<16x32xf32>
    %40 = vector.extract_strided_slice %35 {offsets = [0, 128], sizes = [16, 32], strides = [1, 1]} : vector<16x160xf32> to vector<16x32xf32>
    %41 = tpu.transpose %37, [1, 0] : vector<16x32xf32> -> vector<32x16xf32>
    %cst_26 = arith.constant dense<0.000000e+00> : vector<16x16xf32>
    %42 = tpu.matmul %36, %41, %cst_26 {dimension_numbers = #tpu.dot_dimension_numbers<[1], [0], [0], [1], [0, 0, 1, 1], [], []>} : vector<16x32xf32>, vector<32x16xf32>, vector<16x16xf32> -> vector<16x16xf32>
    %c0_27 = arith.constant 0 : index
    %c0_28 = arith.constant 0 : index
    %43 = vector.load %arg10[%c0_27, %c0_28] : memref<16x16xf32, #tpu.memory_space<vmem>>, vector<16x16xf32>
    %44 = arith.addf %42, %43 : vector<16x16xf32>
    %45 = tpu.transpose %38, [1, 0] : vector<16x32xf32> -> vector<32x16xf32>
    %cst_29 = arith.constant dense<0.000000e+00> : vector<16x16xf32>
    %46 = tpu.matmul %36, %45, %cst_29 {dimension_numbers = #tpu.dot_dimension_numbers<[1], [0], [0], [1], [0, 0, 1, 1], [], []>} : vector<16x32xf32>, vector<32x16xf32>, vector<16x16xf32> -> vector<16x16xf32>
    %c0_30 = arith.constant 0 : index
    %c0_31 = arith.constant 0 : index
    %47 = vector.load %arg11[%c0_30, %c0_31] : memref<16x16xf32, #tpu.memory_space<vmem>>, vector<16x16xf32>
    %48 = arith.addf %46, %47 : vector<16x16xf32>
    %cst_32 = arith.constant dense<0xFF800000> : vector<16xf32>
    %49 = vector.multi_reduction <maximumf>, %44, %cst_32 [1] : vector<16x16xf32> to vector<16xf32>
    %50 = vector.shape_cast %49 : vector<16xf32> to vector<16x1xf32>
    %cst_33 = arith.constant dense<0xFF800000> : vector<16xf32>
    %51 = vector.multi_reduction <maximumf>, %48, %cst_33 [1] : vector<16x16xf32> to vector<16xf32>
    %52 = vector.shape_cast %51 : vector<16xf32> to vector<16x1xf32>
    %53 = arith.maximumf %50, %52 : vector<16x1xf32>
    %cst_34 = arith.constant -1.000000e+29 : f32
    %54 = vector.broadcast %cst_34 : f32 to vector<16x1xf32>
    %55 = arith.cmpf ogt, %53, %54 : vector<16x1xf32>
    %cst_35 = arith.constant 0.000000e+00 : f32
    %56 = vector.broadcast %cst_35 : f32 to vector<16x1xf32>
    %57 = arith.select %55, %53, %56 : vector<16x1xi1>, vector<16x1xf32>
    %58 = vector.broadcast %57 : vector<16x1xf32> to vector<16x16xf32>
    %59 = arith.subf %44, %58 : vector<16x16xf32>
    %60 = math.exp %59 : vector<16x16xf32>
    %61 = vector.broadcast %57 : vector<16x1xf32> to vector<16x16xf32>
    %62 = arith.subf %48, %61 : vector<16x16xf32>
    %63 = math.exp %62 : vector<16x16xf32>
    %cst_36 = arith.constant dense<0.000000e+00> : vector<16xf32>
    %64 = vector.multi_reduction <add>, %60, %cst_36 [1] : vector<16x16xf32> to vector<16xf32>
    %65 = vector.shape_cast %64 : vector<16xf32> to vector<16x1xf32>
    %cst_37 = arith.constant dense<0.000000e+00> : vector<16xf32>
    %66 = vector.multi_reduction <add>, %63, %cst_37 [1] : vector<16x16xf32> to vector<16xf32>
    %67 = vector.shape_cast %66 : vector<16xf32> to vector<16x1xf32>
    %68 = arith.addf %65, %67 : vector<16x1xf32>
    %cst_38 = arith.constant 1.000000e-30 : f32
    %69 = vector.broadcast %cst_38 : f32 to vector<16x1xf32>
    %70 = arith.maximumf %68, %69 : vector<16x1xf32>
    %71 = tpu.reciprocal %70 {approx = true} : vector<16x1xf32> -> vector<16x1xf32>
    %cst_39 = arith.constant dense<0.000000e+00> : vector<16x32xf32>
    %72 = tpu.matmul %60, %39, %cst_39 {dimension_numbers = #tpu.dot_dimension_numbers<[1], [0], [0], [1], [0, 0, 1, 1], [], []>} : vector<16x16xf32>, vector<16x32xf32>, vector<16x32xf32> -> vector<16x32xf32>
    %cst_40 = arith.constant dense<0.000000e+00> : vector<16x32xf32>
    %73 = tpu.matmul %63, %40, %cst_40 {dimension_numbers = #tpu.dot_dimension_numbers<[1], [0], [0], [1], [0, 0, 1, 1], [], []>} : vector<16x16xf32>, vector<16x32xf32>, vector<16x32xf32> -> vector<16x32xf32>
    %74 = arith.addf %72, %73 : vector<16x32xf32>
    %75 = vector.broadcast %71 : vector<16x1xf32> to vector<16x32xf32>
    %76 = arith.mulf %74, %75 : vector<16x32xf32>
    %cst_41 = arith.constant 0.000000e+00 : f32
    %77 = vector.shape_cast %55 : vector<16x1xi1> to vector<16x1xi1>
    %78 = vector.broadcast %77 : vector<16x1xi1> to vector<16x32xi1>
    %79 = vector.broadcast %cst_41 : f32 to vector<16x32xf32>
    %80 = arith.select %78, %76, %79 : vector<16x32xi1>, vector<16x32xf32>
    %81 = arith.mulf %80, %80 : vector<16x32xf32>
    %82 = arith.mulf %80, %81 : vector<16x32xf32>
    %cst_42 = arith.constant 4.471500e-02 : f32
    %83 = vector.broadcast %cst_42 : f32 to vector<16x32xf32>
    %84 = arith.mulf %83, %82 : vector<16x32xf32>
    %85 = arith.addf %80, %84 : vector<16x32xf32>
    %cst_43 = arith.constant 0.797884583 : f32
    %86 = vector.broadcast %cst_43 : f32 to vector<16x32xf32>
    %87 = arith.mulf %86, %85 : vector<16x32xf32>
    %88 = math.tanh %87 : vector<16x32xf32>
    %cst_44 = arith.constant 1.000000e+00 : f32
    %89 = vector.broadcast %cst_44 : f32 to vector<16x32xf32>
    %90 = arith.addf %89, %88 : vector<16x32xf32>
    %cst_45 = arith.constant 5.000000e-01 : f32
    %91 = vector.broadcast %cst_45 : f32 to vector<16x32xf32>
    %92 = arith.mulf %91, %90 : vector<16x32xf32>
    %93 = arith.mulf %80, %92 : vector<16x32xf32>
    %c0_46 = arith.constant 0 : index
    %c0_47 = arith.constant 0 : index
    %94 = vector.load %arg13[%c0_46, %c0_47] : memref<32x32xf32, #tpu.memory_space<vmem>>, vector<32x32xf32>
    %cst_48 = arith.constant dense<0.000000e+00> : vector<16x32xf32>
    %95 = tpu.matmul %93, %94, %cst_48 {dimension_numbers = #tpu.dot_dimension_numbers<[1], [0], [0], [1], [0, 0, 1, 1], [], []>} : vector<16x32xf32>, vector<32x32xf32>, vector<16x32xf32> -> vector<16x32xf32>
    %c0_49 = arith.constant 0 : index
    %c0_50 = arith.constant 0 : index
    %96 = vector.load %arg14[%c0_49, %c0_50] : memref<1x32xf32, #tpu.memory_space<vmem>>, vector<1x32xf32>
    %97 = vector.broadcast %96 : vector<1x32xf32> to vector<16x32xf32>
    %98 = arith.addf %95, %97 : vector<16x32xf32>
    %c0_51 = arith.constant 0 : index
    %c0_52 = arith.constant 0 : index
    %99 = vector.load %arg12[%c0_51, %c0_52] : memref<1x1xf32, #tpu.memory_space<vmem>>, vector<1x1xf32>
    %100 = vector.broadcast %99 : vector<1x1xf32> to vector<16x32xf32>
    %101 = arith.mulf %100, %98 : vector<16x32xf32>
    %cst_53 = arith.constant 1.000000e+00 : f32
    %102 = vector.broadcast %cst_53 : f32 to vector<1x1xf32>
    %103 = arith.subf %102, %99 : vector<1x1xf32>
    %104 = vector.broadcast %103 : vector<1x1xf32> to vector<16x32xf32>
    %105 = arith.mulf %104, %30 : vector<16x32xf32>
    %106 = arith.addf %101, %105 : vector<16x32xf32>
    %c0_54 = arith.constant 0 : index
    %c0_55 = arith.constant 0 : index
    %107 = vector.load %arg15[%c0_54, %c0_55] : memref<32x32xf32, #tpu.memory_space<vmem>>, vector<32x32xf32>
    %cst_56 = arith.constant dense<0.000000e+00> : vector<16x32xf32>
    %108 = tpu.matmul %106, %107, %cst_56 {dimension_numbers = #tpu.dot_dimension_numbers<[1], [0], [0], [1], [0, 0, 1, 1], [], []>} : vector<16x32xf32>, vector<32x32xf32>, vector<16x32xf32> -> vector<16x32xf32>
    %c0_57 = arith.constant 0 : index
    %c0_58 = arith.constant 0 : index
    %109 = vector.load %arg16[%c0_57, %c0_58] : memref<1x32xf32, #tpu.memory_space<vmem>>, vector<1x32xf32>
    %110 = vector.broadcast %109 : vector<1x32xf32> to vector<16x32xf32>
    %111 = arith.addf %108, %110 : vector<16x32xf32>
    %cst_59 = arith.constant 0.000000e+00 : f32
    %112 = vector.broadcast %cst_59 : f32 to vector<16x32xf32>
    %113 = arith.cmpf ogt, %111, %112 : vector<16x32xf32>
    %cst_60 = arith.constant 0.00999999977 : f32
    %114 = vector.broadcast %cst_60 : f32 to vector<16x32xf32>
    %115 = arith.mulf %114, %111 : vector<16x32xf32>
    %116 = arith.select %113, %111, %115 : vector<16x32xi1>, vector<16x32xf32>
    %c0_61 = arith.constant 0 : index
    %c0_62 = arith.constant 0 : index
    %117 = vector.load %arg17[%c0_61, %c0_62] : memref<32x128xf32, #tpu.memory_space<vmem>>, vector<32x128xf32>
    %cst_63 = arith.constant dense<0.000000e+00> : vector<16x128xf32>
    %118 = tpu.matmul %116, %117, %cst_63 {dimension_numbers = #tpu.dot_dimension_numbers<[1], [0], [0], [1], [0, 0, 1, 1], [], []>} : vector<16x32xf32>, vector<32x128xf32>, vector<16x128xf32> -> vector<16x128xf32>
    %c0_64 = arith.constant 0 : index
    %c0_65 = arith.constant 0 : index
    %119 = vector.load %arg18[%c0_64, %c0_65] : memref<1x128xf32, #tpu.memory_space<vmem>>, vector<1x128xf32>
    %120 = vector.broadcast %119 : vector<1x128xf32> to vector<16x128xf32>
    %121 = arith.addf %118, %120 : vector<16x128xf32>
    %c0_66 = arith.constant 0 : index
    %c0_67 = arith.constant 0 : index
    %122 = vector.load %arg19[%c0_66, %c0_67] : memref<16x128xf32, #tpu.memory_space<vmem>>, vector<16x128xf32>
    tpu.vector_store %arg19[%c0_66, %c0_67], %121 {strides = array<i32>} : memref<16x128xf32, #tpu.memory_space<vmem>>, vector<16x128xf32>,
    return
  }
  func.func @transform_0(%arg0: i32) -> (i32, i32) {
    %c0_i32 = arith.constant 0 : i32
    %c0_i32_0 = arith.constant 0 : i32
    %c0_i32_1 = arith.constant 0 : i32
    return %c0_i32, %c0_i32_0 : i32, i32
  }
  func.func @transform_1(%arg0: i32) -> (i32, i32) {
    %c0_i32 = arith.constant 0 : i32
    %c0_i32_0 = arith.constant 0 : i32
    %c0_i32_1 = arith.constant 0 : i32
    return %c0_i32, %c0_i32_0 : i32, i32
  }
  func.func @transform_2(%arg0: i32) -> (i32, i32) {
    %c0_i32 = arith.constant 0 : i32
    %c0_i32_0 = arith.constant 0 : i32
    %c0_i32_1 = arith.constant 0 : i32
    return %c0_i32, %c0_i32_0 : i32, i32
  }
  func.func @transform_3(%arg0: i32) -> (i32, i32) {
    %c0_i32 = arith.constant 0 : i32
    %c0_i32_0 = arith.constant 0 : i32
    %c0_i32_1 = arith.constant 0 : i32
    return %c0_i32, %c0_i32_0 : i32, i32
  }
  func.func @transform_4(%arg0: i32) -> (i32, i32) {
    %c0_i32 = arith.constant 0 : i32
    %c0_i32_0 = arith.constant 0 : i32
    %c0_i32_1 = arith.constant 0 : i32
    return %c0_i32, %c0_i32_0 : i32, i32
  }
  func.func @transform_5(%arg0: i32) -> (i32, i32) {
    %c0_i32 = arith.constant 0 : i32
    %c0_i32_0 = arith.constant 0 : i32
    %c0_i32_1 = arith.constant 0 : i32
    return %c0_i32, %c0_i32_0 : i32, i32
  }
  func.func @transform_6(%arg0: i32) -> (i32, i32) {
    %c0_i32 = arith.constant 0 : i32
    %c0_i32_0 = arith.constant 0 : i32
    %c0_i32_1 = arith.constant 0 : i32
    return %c0_i32, %c0_i32_0 : i32, i32
  }
  func.func @transform_7(%arg0: i32) -> (i32, i32) {
    %c0_i32 = arith.constant 0 : i32
    %c0_i32_0 = arith.constant 0 : i32
    %c0_i32_1 = arith.constant 0 : i32
    return %c0_i32, %c0_i32_0 : i32, i32
  }
  func.func @transform_8(%arg0: i32) -> (i32, i32) {
    %c0_i32 = arith.constant 0 : i32
    %c0_i32_0 = arith.constant 0 : i32
    %c0_i32_1 = arith.constant 0 : i32
    return %c0_i32, %c0_i32_0 : i32, i32
  }
  func.func @transform_9(%arg0: i32) -> (i32, i32) {
    %c0_i32 = arith.constant 0 : i32
    %c0_i32_0 = arith.constant 0 : i32
    %c0_i32_1 = arith.constant 0 : i32
    return %c0_i32, %c0_i32_0 : i32, i32
  }
  func.func @transform_10(%arg0: i32) -> (i32, i32) {
    %c0_i32 = arith.constant 0 : i32
    %c0_i32_0 = arith.constant 0 : i32
    %c0_i32_1 = arith.constant 0 : i32
    return %c0_i32, %c0_i32_0 : i32, i32
  }
  func.func @transform_11(%arg0: i32) -> (i32, i32) {
    %c0_i32 = arith.constant 0 : i32
    %c0_i32_0 = arith.constant 0 : i32
    %c0_i32_1 = arith.constant 0 : i32
    return %c0_i32, %c0_i32_0 : i32, i32
  }
  func.func @transform_12(%arg0: i32) -> (i32, i32) {
    %c0_i32 = arith.constant 0 : i32
    %c0_i32_0 = arith.constant 0 : i32
    %c0_i32_1 = arith.constant 0 : i32
    return %c0_i32, %c0_i32_0 : i32, i32
  }
  func.func @transform_13(%arg0: i32) -> (i32, i32) {
    %c0_i32 = arith.constant 0 : i32
    %c0_i32_0 = arith.constant 0 : i32
    %c0_i32_1 = arith.constant 0 : i32
    return %c0_i32, %c0_i32_0 : i32, i32
  }
  func.func @transform_14(%arg0: i32) -> (i32, i32) {
    %c0_i32 = arith.constant 0 : i32
    %c0_i32_0 = arith.constant 0 : i32
    %c0_i32_1 = arith.constant 0 : i32
    return %c0_i32, %c0_i32_0 : i32, i32
  }
  func.func @transform_15(%arg0: i32) -> (i32, i32) {
    %c0_i32 = arith.constant 0 : i32
    %c0_i32_0 = arith.constant 0 : i32
    %c0_i32_1 = arith.constant 0 : i32
    return %c0_i32, %c0_i32_0 : i32, i32
  }
  func.func @transform_16(%arg0: i32) -> (i32, i32) {
    %c0_i32 = arith.constant 0 : i32
    %c0_i32_0 = arith.constant 0 : i32
    %c0_i32_1 = arith.constant 0 : i32
    return %c0_i32, %c0_i32_0 : i32, i32
  }
  func.func @transform_17(%arg0: i32) -> (i32, i32) {
    %c0_i32 = arith.constant 0 : i32
    %c0_i32_0 = arith.constant 0 : i32
    %c0_i32_1 = arith.constant 0 : i32
    return %c0_i32, %c0_i32_0 : i32, i32
  }
  func.func @transform_18(%arg0: i32) -> (i32, i32) {
    %c0_i32 = arith.constant 0 : i32
    %c0_i32_0 = arith.constant 0 : i32
    %c0_i32_1 = arith.constant 0 : i32
    return %c0_i32, %c0_i32_0 : i32, i32
  }
}

</mosaic_0001>

<bundles_post_ra>
// kernel: user_forward.1
= control target key start
LH: loop header
LB: loop body
LE: loop exit
PB: predicated region body
PF: predicated region fallthrough
CT: control target
= control target key end

     0   :  { %vm79_vm0 = vcmask 1040384   ;;  %vm72_vm1 = vcmask 72704   ;;  %vm1461_vm2 = vmmov 1   ;;  %vm173_vm6 = vcmask 130048   ;;  %s1747_s1 = inlined_call_operand.vmem [shape: f32[9,16], index: 1, kind: input, shape index: {}]   ;;  %s1748_s0 = inlined_call_operand.vmem [shape: f32[16,9], index: 0, kind: input, shape index: {}]   ;;  %s1749_s3 = inlined_call_operand.vmem [shape: f32[16,16], index: 3, kind: input, shape index: {}]   ;;  %s1750_s2 = inlined_call_operand.vmem [shape: f32[1,16], index: 2, kind: input, shape index: {}]   ;;  %s1751_s5 = inlined_call_operand.vmem [shape: f32[16,32], index: 5, kind: input, shape index: {}]   ;;  %s1752_s7 = inlined_call_operand.vmem [shape: f32[32,160], index: 7, kind: input, shape index: {}]   ;;  %s1753_s4 = inlined_call_operand.vmem [shape: f32[1,16], index: 4, kind: input, shape index: {}]   ;;  %s1754_s6 = inlined_call_operand.vmem [shape: f32[1,32], index: 6, kind: input, shape index: {}]   ;;  %s1755_s8 = inlined_call_operand.vmem [shape: f32[1,160], index: 8, kind: input, shape index: {}]   ;;  %s1756_s9 = inlined_call_operand.vmem [shape: f32[16,16], index: 9, kind: input, shape index: {}]   ;;  %s1757_s10 = inlined_call_operand.vmem [shape: f32[16,16], index: 10, kind: input, shape index: {}]   ;;  %s1758_s11 = inlined_call_operand.<no memory space> [shape: f32[1,1], index: 11, kind: input, shape index: {}]   ;;  %s1759_s12 = inlined_call_operand.vmem [shape: f32[32,32], index: 12, kind: input, shape index: {}]   ;;  %s1760_s14 = inlined_call_operand.vmem [shape: f32[32,32], index: 14, kind: input, shape index: {}]   ;;  %s1761_s13 = inlined_call_operand.vmem [shape: f32[1,32], index: 13, kind: input, shape index: {}]   ;;  %s1762_s16 = inlined_call_operand.vmem [shape: f32[32,128], index: 16, kind: input, shape index: {}]   ;;  %s1763_s15 = inlined_call_operand.vmem [shape: f32[1,32], index: 15, kind: input, shape index: {}]   ;;  %s1764_s17 = inlined_call_operand.vmem [shape: f32[1,128], index: 17, kind: input, shape index: {}]   ;;  %s1765_s18 = inlined_call_operand.vmem [shape: f32[16,128], index: 18, kind: output, shape index: {}]  }
   0x1   :  { %1769 = sst [smem:[#allocation3_spill]] %s1747_s1  ;;  %vm1355_vm3 = vmpackc.low %vm79_vm0, %vm1461_vm2  ;;  %v1193_v8 = vld [vmem:[%s1750_s2] ss:$0 sm:$0xff]  ;;  %v262_v18 = vld [vmem:[%s1751_s5 + $0x8] sm:$0xff]  ;;  %v1462_v41 = vmov 0.0   ;;  %vm377_vm10 = vcmask 261120   ;;  %v367_v51 = vlaneseq }
   0x2   :  { %1770 = sst [smem:[#allocation4_spill]] %s1748_s0  ;;  %s1772_s29 = sld [smem:[#allocation3_spill]]  ;;  %v261_v17 = vld [vmem:[%s1751_s5] sm:$0xff]  ;;  %v358_v20 = vld [vmem:[%s1752_s7 + $0x8] sm:$0xff]  ;;  %v360_v21 = vld [vmem:[%s1752_s7 + $0x18] sm:$0xff] }
   0x3   :  { %1771 = sst [smem:[#allocation5_spill]] %s1749_s3  ;;  %s1773_s20 = sld [smem:[#allocation4_spill]]  ;;  %v1364_v19 = vpack.c.bf16 %v262_v18, %v261_v17  ;;  %v1368_v22 = vpack.c.bf16 %v360_v21, %v358_v20  ;;  %v1197_v23 = vld [vmem:[%s1753_s4] ss:$0 sm:$0xff]  ;;  %v359_v33 = vld [vmem:[%s1752_s7 + $0x10] sm:$0xff]  ;;  %v362_v35 = vld [vmem:[%s1752_s7 + $0x28] sm:$0xff] }
   0x4   :  { %s1774_s24 = sld [smem:[#allocation5_spill]]  ;;  %v357_v32 = vld [vmem:[%s1752_s7] sm:$0xff]  ;;  %v364_v36 = vld [vmem:[%s1752_s7 + $0x38] sm:$0xff]  ;;  %v363_v39 = vld [vmem:[%s1752_s7 + $0x30] sm:$0xff]  ;;  %v368_v52 = vshrl.u32 %v367_v51, 7 }
   0x5   :  { %v1370_v34 = vpack.c.bf16 %v359_v33, %v357_v32  ;;  %v1372_v37 = vpack.c.bf16 %v364_v36, %v362_v35  ;;  %v361_v38 = vld [vmem:[%s1752_s7 + $0x20] sm:$0xff]  ;;  %vm1377_vm12 = vmpackc.low %vm377_vm10, %vm377_vm10 }
   0x6   :  { %v1374_v40 = vpack.c.bf16 %v363_v39, %v361_v38  ;;  %v1200_v42 = vld [vmem:[%s1754_s6] ss:$0 sm:$0xff]  ;;  %v1631_v53 = vsub.s32 0, %v368_v52  ;;  %v373_v56 = vsub.s32 1, %v368_v52 }
   0x7   :  { %v365_v54 = vld [vmem:[%s1755_s8] sm:$0x3]  ;;  %s1464_s8 = smov 64  }
   0x8   :  { %v63_v0 = vld [vmem:[%s1772_s29] sm:$0xff]  ;;  %v64_v1 = vld [vmem:[%s1772_s29 + $0x8] sm:$0x1]  ;;  %v370_v55 = vrot.slane %v365_v54, %v1631_v53  ;;  %v374_v60 = vrot.slane %v365_v54, %v373_v56 }
   0x9   :  { %v1354_v2 = vpack.c.bf16 %v64_v1, %v63_v0  ;;  %v61_v3 = vld [vmem:[%s1773_s20] sm:$0xff]  ;;  %v62_v4 = vld [vmem:[%s1773_s20 + $0x8] sm:$0xff]  ;;  %s1463_s20 = smov 96  }
   0xa   :  { %1276 = vmatprep.mubr.msk.f32.mxu0 %vm72_vm1, %v61_v3  ;;  %v164_v5 = vld [vmem:[%s1774_s24] sm:$0xff]  ;;  %v165_v6 = vld [vmem:[%s1774_s24 + $0x8] sm:$0xff] }
   0xb   :  { %1356 = vmatprep.subr.msk.bf16.mxu0 %vm1355_vm3, %v1354_v2  ;;  %v1360_v7 = vpack.c.bf16 %v165_v6, %v164_v5  ;;  %v461_v18 = vld [vmem:[%s1756_s9] sm:$0xff] }
   0xc   :  { %1359 = vmatpush3.bf16.msk.msra.mxu0 %vm1355_vm3, %v1354_v2 }
   0xd   :  { %1361 = vmatprep.subr.bf16.mxu1 %v1360_v7  ;;  %1365 = vmatprep.subr.bf16.mxu0 %v1364_v19 }
   0xe   :  { %1363 = vmatpush3.bf16.msra.mxu1 %v1360_v7 }
   0xf   :  { %1277 = vmatmul.mubr.msk.f32.vlgmr.msra.gmra.mrb[0].mxu0 %vm72_vm1, %v62_v4  ;;  %1369 = vmatprep.subr.bf16.mxu1 %v1368_v22 }
  0x10   :  { %1367 = vmatpush3.bf16.msra.mxu0 %v1364_v19 }
  0xe2   :  { %v1278_v9 = vpop.f32.mrb[0].mxu0 }
  0xe3   :  { %v155_v10 = vadd.f32 %v1278_v9, %v1193_v8  ;;  %v149_v11 = vpop.f32.mrb[1].mxu0 }
  0xe4   :  { %v150_v12 = vadd.f32 %v1193_v8, %v149_v11 }
  0xe5   :  { %v161_v13 = vmul.f32 0.01, %v155_v10  ;;  %vm159_vm4 = vcmp.gt.f32.partialorder %v155_v10, 0.0 }
  0xe6   :  { %vm158_vm5 = vcmp.gt.f32.partialorder %v150_v12, 0.0  ;;  %v160_v14 = vmul.f32 0.01, %v150_v12 }
  0xe7   :  { %v163_v16 = vsel %vm159_vm4, %v155_v10, %v161_v13 }
  0xe8   :  { %v162_v15 = vsel %vm158_vm5, %v150_v12, %v160_v14  ;;  %v462_v12 = vld [vmem:[%s1756_s9 + $0x8] sm:$0xff]  ;;  %s1465_s9 = smov 32  }
  0xe9   :  { %1283 = vmatprep.mubr.msk.f32.mxu1 %vm173_vm6, %v162_v15 }
  0xea   :  { %1284 = vmatmul.mubr.msk.f32.vlgmr.msra.gmra.mrb[0].mxu1 %vm173_vm6, %v163_v16  ;;  %v553_v16 = vld [vmem:[%s1757_s10 + $0x8] sm:$0xff] }
  0xeb   :  { %1371 = vmatpush1.bf16.msra.mxu1 %v1370_v34  ;;  %448 = vmatprep.mubr.f32.mxu1 %v1462_v41 }
  0xec   :  { %1373 = vmatprep.subr.bf16.mxu1 %v1372_v37 }
  0xef   :  { %1375 = vmatpush1.bf16.msra.mxu1 %v1374_v40 }
 0x1bd   :  { %v1285_v24 = vpop.f32.mrb[0].mxu1 }
 0x1be   :  { %v252_v25 = vadd.f32 %v1285_v24, %v1197_v23  ;;  %v246_v26 = vpop.f32.mrb[1].mxu1  ;;  %v552_v24 = vld [vmem:[%s1757_s10] sm:$0xff] }
 0x1bf   :  { %v247_v27 = vadd.f32 %v1197_v23, %v246_v26 }
 0x1c0   :  { %v258_v28 = vmul.f32 0.01, %v252_v25  ;;  %vm256_vm7 = vcmp.gt.f32.partialorder %v252_v25, 0.0 }
 0x1c1   :  { %vm255_vm8 = vcmp.gt.f32.partialorder %v247_v27, 0.0  ;;  %v257_v29 = vmul.f32 0.01, %v247_v27 }
 0x1c2   :  { %v260_v31 = vsel %vm256_vm7, %v252_v25, %v258_v28  ;;  %v23_v28 = vstv %s1758_s11 }
 0x1c3   :  { %v259_v30 = vsel %vm255_vm8, %v247_v27, %v257_v29  ;;  %24 = vst [vmem:[#allocation2] sm:$0x1] %v23_v28  ;;  %v1466_v29 = vmov 0  }
 0x1c4   :  { %1290 = vmatprep.mubr.msk.f32.mxu0 %vm173_vm6, %v259_v30  ;;  %1444 = vset.pattern.permute.xlu1 %v1466_v29 }
 0x1c5   :  { %1291 = vmatmul.mubr.msk.f32.vlgmr.msra.gmra.mrb[2].mxu0 %vm173_vm6, %v260_v31  ;;  %1443 = vset.pattern.permute.xlu0 %v1466_v29 }
 0x298   :  { %v1292_v43 = vpop.f32.mrb[2].mxu0 }
 0x299   :  { %v342_v44 = vpop.f32.mrb[3].mxu0  ;;  %v348_v45 = vadd.f32 %v1292_v43, %v1200_v42 }
 0x29a   :  { %v343_v46 = vadd.f32 %v1200_v42, %v342_v44 }
 0x29b   :  { %v354_v48 = vmul.f32 0.01, %v348_v45  ;;  %vm352_vm11 = vcmp.gt.f32.partialorder %v348_v45, 0.0 }
 0x29c   :  { %vm351_vm9 = vcmp.gt.f32.partialorder %v343_v46, 0.0  ;;  %v353_v47 = vmul.f32 0.01, %v343_v46 }
 0x29d   :  { %v1627_v50 = vsel %vm352_vm11, %v348_v45, %v354_v48 }
 0x29e   :  { %v1623_v49 = vsel %vm351_vm9, %v343_v46, %v353_v47 }
 0x29f   :  { %1203 = vmatmul.mubr.msk.f32.vlgmr.msra.gmra.mrb[2].mxu1 %vm377_vm10, %v1623_v49 }
 0x2a0   :  { %454 = vmatprep.mubr.f32.mxu1 %v1462_v41 }
 0x2a3   :  { %1204 = vmatmul.mubr.msk.f32.gmra.mrb[4].mxu1 %vm377_vm10, %v1627_v50 }
 0x372   :  { %v450_v57 = vpop.f32.mrb[2].mxu1 }
 0x373   :  { %v451_v58 = vadd.f32 %v450_v57, %v370_v55  ;;  %v452_v59 = vpop.f32.mrb[3].mxu1 }
 0x374   :  { %v453_v0 = vadd.f32 %v452_v59, %v374_v60 }
 0x375   :  { %1297 = vmatprep.mubr.msk.f32.mxu0 %vm377_vm10, %v451_v58  ;;  %1304 = vmatprep.mubr.msk.f32.mxu1 %vm377_vm10, %v451_v58 }
 0x376   :  { %v456_v61 = vpop.f32.mrb[4].mxu1 }
 0x377   :  { %v457_v62 = vadd.f32 %v456_v61, %v370_v55  ;;  %v458_v63 = vpop.f32.mrb[5].mxu1  ;;  %v971_v61 = vld [vmem:[#allocation2] sm:$0x1] }
 0x378   :  { %v459_v1 = vadd.f32 %v458_v63, %v374_v60 }
 0x379   :  { %v1428_v2 = vpack.i.bf16 %v457_v62, %v451_v58 }
 0x37a   :  { %v1388_v3 = vpack.c.bf16 %v459_v1, %v453_v0  ;;  %v879_v0 = vld [vmem:[%s1759_s12] sm:$0xff]  ;;  %v880_v1 = vld [vmem:[%s1759_s12 + $0x8] sm:$0xff] }
 0x37b   :  { %1429 = vrot.lane.b32.xlu0 %v1428_v2, %s1463_s20 }
 0x37f   :  { %1434 = vrot.lane.b32.xlu0 %v1428_v2, %s1464_s8 }
 0x3ed   :  { %v1430_v4 = vpop.permute.xlu0 %1429 }
 0x3ee   :  { %v1432_v5 = vunpack.i.h.bf16 %v1430_v4  ;;  %v1431_v6 = vunpack.i.l.bf16 %v1430_v4  ;;  %v882_v4 = vld [vmem:[%s1759_s12 + $0x18] sm:$0xff] }
 0x3f0   :  { %v1376_v7 = vpack.c.bf16 %v1432_v5, %v1431_v6  ;;  %v976_v6 = vrot.slane %v971_v61, %v1631_v53 }
 0x3f1   :  { %v1435_v8 = vpop.permute.xlu0 %1434 }
 0x3f2   :  { %v1437_v9 = vunpack.i.h.bf16 %v1435_v8  ;;  %v1436_v10 = vunpack.i.l.bf16 %v1435_v8  ;;  %1378 = vmatprep.subr.msk.bf16.mxu0 %vm1377_vm12, %v1376_v7 }
 0x3f3   :  { %1381 = vmatpush3.bf16.xpose.msk.msra.mxu0 %vm1377_vm12, %v1376_v7 }
 0x3f4   :  { %v1382_v11 = vpack.c.bf16 %v1437_v9, %v1436_v10  ;;  %1389 = vmatprep.subr.bf16.mxu0 %v1388_v3 }
 0x3f6   :  { %1384 = vmatprep.subr.msk.bf16.mxu1 %vm1377_vm12, %v1382_v11 }
 0x3f7   :  { %1387 = vmatpush3.bf16.xpose.msk.msra.mxu1 %vm1377_vm12, %v1382_v11 }
 0x3fa   :  { %1298 = vmatmul.mubr.msk.f32.vlgmr.msra.gmra.mrb[4].mxu0 %vm377_vm10, %v457_v62 }
 0x3fb   :  { %1391 = vmatpush3.bf16.msra.mxu0 %v1388_v3  ;;  %v881_v3 = vld [vmem:[%s1759_s12 + $0x10] sm:$0xff] }
 0x3fc   :  { %v1400_v5 = vpack.c.bf16 %v882_v4, %v881_v3 }
 0x3fe   :  { %1305 = vmatmul.mubr.msk.f32.vlgmr.msra.gmra.mrb[6].mxu1 %vm377_vm10, %v457_v62  ;;  %v983_v62 = vsub.f32 1.0, %v971_v61 }
 0x400   :  { %v988_v63 = vrot.slane %v983_v62, %v1631_v53  ;;  %v1095_v62 = vld [vmem:[%s1762_s16] sm:$0xff] }
 0x4cd   :  { %v1299_v13 = vpop.f32.mrb[4].mxu0 }
 0x4ce   :  { %v549_v14 = vadd.f32 %v1299_v13, %v462_v12  ;;  %v543_v15 = vpop.f32.mrb[5].mxu0 }
 0x4cf   :  { %v544_v22 = vadd.f32 %v543_v15, %v461_v18 }
 0x4d0   :  { %v640_v17 = vsel %vm173_vm6, %v549_v14, -inf }
 0x4d1   :  { %v1306_v19 = vpop.f32.mrb[6].mxu1  ;;  %641 = vmax.xlane.f32.xlu0 %v640_v17  ;;  %v637_v26 = vsel %vm173_vm6, %v544_v22, -inf }
 0x4d2   :  { %v634_v20 = vadd.f32 %v1306_v19, %v553_v16  ;;  %v628_v21 = vpop.f32.mrb[7].mxu1 }
 0x4d3   :  { %v629_v25 = vadd.f32 %v628_v21, %v552_v24 }
 0x4d4   :  { %v646_v23 = vsel %vm173_vm6, %v634_v20, -inf }
 0x4d5   :  { %647 = vmax.xlane.f32.xlu1 %v646_v23  ;;  %v643_v27 = vsel %vm173_vm6, %v629_v25, -inf }
 0x4d9   :  { %638 = vmax.xlane.f32.xlu1 %v637_v26 }
 0x4dd   :  { %644 = vmax.xlane.f32.xlu1 %v643_v27 }
 0x4ee   :  { %1439 = vrot.lane.b32.xlu1 %v1428_v2, %s1465_s9  ;;  %v1396_v2 = vpack.c.bf16 %v880_v1, %v879_v0 }
 0x4f0   :  { %1397 = vmatprep.subr.bf16.mxu1 %v1396_v2 }
 0x4f1   :  { %1399 = vmatpush3.bf16.msra.mxu1 %v1396_v2  ;;  %v1220_v2 = vld [vmem:[%s1763_s15] ss:$0 sm:$0xff] }
 0x4f2   :  { %1401 = vmatprep.subr.bf16.mxu1 %v1400_v5 }
 0x4f5   :  { %1403 = vmatpush3.bf16.msra.mxu1 %v1400_v5 }
 0x55e   :  { %v642_v30 = vpop.xlane.xlu0 %641 }
 0x562   :  { %v648_v31 = vpop.xlane.xlu1 %647 }
 0x563   :  { %v1662_v32 = vmax.f32 %v642_v30, %v648_v31 }
 0x565   :  { %vm652_vm13 = vcmp.gt.f32.partialorder %v1662_v32, -1e+29 }
 0x566   :  { %v654_v33 = vsel %vm652_vm13, %v1662_v32, 0.0  ;;  %v639_v34 = vpop.xlane.xlu1 %638 }
 0x567   :  { %v656_v35 = vsub.f32 %v549_v14, %v654_v33  ;;  %v662_v39 = vsub.f32 %v634_v20, %v654_v33 }
 0x569   :  { %v659_v36 = vmul.f32 1.442695, %v656_v35  ;;  %v665_v46 = vmul.f32 1.442695, %v662_v39 }
 0x56a   :  { %v645_v37 = vpop.xlane.xlu1 %644 }
 0x56b   :  { %1445 = vpow2.f32 %v659_v36  ;;  %v1668_v38 = vmax.f32 %v639_v34, %v645_v37 }
 0x56d   :  { %vm651_vm14 = vcmp.gt.f32.partialorder %v1668_v38, -1e+29 }
 0x56e   :  { %v653_v40 = vsel %vm651_vm14, %v1668_v38, 0.0  ;;  %v1440_v41 = vpop.permute.xlu1 %1439 }
 0x56f   :  { %v655_v42 = vsub.f32 %v544_v22, %v653_v40  ;;  %v661_v43 = vsub.f32 %v629_v25, %v653_v40  ;;  %v1442_v44 = vunpack.i.h.bf16 %v1440_v41  ;;  %v1441_v45 = vunpack.i.l.bf16 %v1440_v41  ;;  %v997_v40 = vld [vmem:[%s1760_s14] sm:$0xff]  ;;  %v998_v41 = vld [vmem:[%s1760_s14 + $0x8] sm:$0xff] }
 0x571   :  { %v657_v47 = vmul.f32 1.442695, %v655_v42  ;;  %v663_v48 = vmul.f32 1.442695, %v661_v43  ;;  %v1392_v51 = vpack.c.bf16 %v1442_v44, %v1441_v45  ;;  %v1404_v42 = vpack.c.bf16 %v998_v41, %v997_v40  ;;  %v999_v43 = vld [vmem:[%s1760_s14 + $0x10] sm:$0xff]  ;;  %v1000_v44 = vld [vmem:[%s1760_s14 + $0x18] sm:$0xff] }
 0x572   :  { %v1408_v45 = vpack.c.bf16 %v1000_v44, %v999_v43 }
 0x573   :  { %1447 = vpow2.f32 %v657_v47  ;;  %1393 = vmatprep.subr.bf16.mxu0 %v1392_v51 }
 0x574   :  { %1449 = vpow2.f32 %v663_v48 }
 0x575   :  { %v1446_v52 = vpop.eup %1445  ;;  %1451 = vpow2.f32 %v665_v46  ;;  %v1217_v46 = vld [vmem:[%s1761_s13] ss:$0 sm:$0xff] }
 0x576   :  { %v670_v54 = vsel %vm173_vm6, %v1446_v52, 0.0 }
 0x577   :  { %671 = vadd.xlane.f32.xlu0 %v670_v54 }
 0x57d   :  { %v1448_v55 = vpop.eup %1447 }
 0x57e   :  { %v1450_v56 = vpop.eup %1449  ;;  %v667_v57 = vsel %vm173_vm6, %v1448_v55, 0.0 }
 0x57f   :  { %v1452_v58 = vpop.eup %1451  ;;  %1311 = vmatprep.mubr.msk.f32.mxu0 %vm173_vm6, %v1450_v56  ;;  %v673_v59 = vsel %vm173_vm6, %v1450_v56, 0.0  ;;  %668 = vadd.xlane.f32.xlu1 %v667_v57 }
 0x580   :  { %1312 = vmatmul.mubr.msk.f32.vlgmr.msra.gmra.mrb[6].mxu0 %vm173_vm6, %v1452_v58  ;;  %674 = vadd.xlane.f32.xlu0 %v673_v59  ;;  %v676_v60 = vsel %vm173_vm6, %v1452_v58, 0.0 }
 0x581   :  { %1395 = vmatpush3.bf16.msra.mxu0 %v1392_v51  ;;  %1318 = vmatprep.mubr.msk.f32.mxu0 %vm173_vm6, %v1448_v55 }
 0x582   :  { %1405 = vmatprep.subr.bf16.mxu0 %v1404_v42 }
 0x584   :  { %677 = vadd.xlane.f32.xlu0 %v676_v60 }
 0x588   :  { %1319 = vmatmul.mubr.msk.f32.vlgmr.msra.gmra.mrb[6].mxu0 %vm173_vm6, %v1446_v52 }
 0x589   :  { %1407 = vmatpush3.bf16.msra.mxu0 %v1404_v42 }
 0x58a   :  { %1409 = vmatprep.subr.bf16.mxu0 %v1408_v45 }
 0x58d   :  { %1411 = vmatpush3.bf16.msra.mxu0 %v1408_v45 }
 0x590   :  { %990 = vperm.xlu1 %1444, %v988_v63   ;;  %v1096_v63 = vld [vmem:[%s1762_s16 + $0x8] sm:$0xff] }
 0x591   :  { %v1412_v0 = vpack.c.bf16 %v1096_v63, %v1095_v62 }
 0x593   :  { %1413 = vmatprep.subr.bf16.mxu1 %v1412_v0 }
 0x59a   :  { %978 = vperm.xlu0 %1443, %v976_v6  }
 0x604   :  { %v672_v7 = vpop.xlane.xlu0 %671 }
 0x60c   :  { %v669_v10 = vpop.xlane.xlu1 %668 }
 0x60d   :  { %v675_v8 = vpop.xlane.xlu0 %674 }
 0x60e   :  { %v679_v12 = vadd.f32 %v675_v8, %v669_v10 }
 0x610   :  { %v681_v14 = vmax.f32 %v679_v12, 1e-30  ;;  %v991_v51 = vpop.permute.xlu1 %990 }
 0x611   :  { %v678_v9 = vpop.xlane.xlu0 %677  ;;  %v993_v57 = vmul.f32 %v991_v51, %v1623_v49  ;;  %v994_v59 = vmul.f32 %v991_v51, %v1627_v50  ;;  %v1097_v49 = vld [vmem:[%s1762_s16 + $0x10] sm:$0xff]  ;;  %v1098_v50 = vld [vmem:[%s1762_s16 + $0x18] sm:$0xff] }
 0x612   :  { %v680_v11 = vadd.f32 %v678_v9, %v672_v7  ;;  %v1416_v1 = vpack.c.bf16 %v1098_v50, %v1097_v49 }
 0x614   :  { %v682_v13 = vmax.f32 %v680_v11, 1e-30  ;;  %v1223_v11 = vld [vmem:[%s1764_s17] ss:$0 sm:$0xff] }
 0x616   :  { %1453 = vrcp.f32 %v682_v13 }
 0x617   :  { %1455 = vrcp.f32 %v681_v14 }
 0x619   :  { %v979_v48 = vpop.permute.xlu0 %978 }
 0x620   :  { %v1454_v15 = vpop.eup %1453 }
 0x621   :  { %v1456_v17 = vpop.eup %1455 }
 0x65b   :  { %v1320_v16 = vpop.f32.mrb[6].mxu0 }
 0x65c   :  { %v854_v18 = vmul.f32 %v1454_v15, %v1320_v16  ;;  %v844_v19 = vpop.f32.mrb[7].mxu0 }
 0x65d   :  { %v853_v20 = vmul.f32 %v1456_v17, %v844_v19 }
 0x65e   :  { %v860_v53 = vsel %vm652_vm13, %v854_v18, 0.0 }
 0x65f   :  { %v862_v21 = vmul.f32 %v860_v53, %v860_v53  ;;  %v859_v22 = vsel %vm651_vm14, %v853_v20, 0.0 }
 0x660   :  { %v861_v23 = vmul.f32 %v859_v22, %v859_v22 }
 0x661   :  { %v864_v24 = vmul.f32 %v862_v21, %v860_v53 }
 0x662   :  { %v863_v25 = vmul.f32 %v861_v23, %v859_v22 }
 0x663   :  { %v866_v26 = vmul.f32 0.044715, %v864_v24 }
 0x664   :  { %v865_v27 = vmul.f32 0.044715, %v863_v25 }
 0x665   :  { %v868_v28 = vadd.f32 %v866_v26, %v860_v53 }
 0x666   :  { %v867_v29 = vadd.f32 %v865_v27, %v859_v22 }
 0x667   :  { %v870_v30 = vmul.f32 0.7978846, %v868_v28 }
 0x668   :  { %v869_v31 = vmul.f32 0.7978846, %v867_v29 }
 0x669   :  { %1457 = vtanh.f32 %v870_v30 }
 0x66a   :  { %1459 = vtanh.f32 %v869_v31 }
 0x673   :  { %v1458_v33 = vpop.eup %1457 }
 0x674   :  { %v1460_v34 = vpop.eup %1459  ;;  %v874_v35 = vadd.f32 1.0, %v1458_v33 }
 0x675   :  { %v873_v32 = vadd.f32 1.0, %v1460_v34 }
 0x676   :  { %v876_v36 = vmul.f32 0.5, %v874_v35 }
 0x677   :  { %v875_v37 = vmul.f32 0.5, %v873_v32 }
 0x678   :  { %v878_v38 = vmul.f32 %v876_v36, %v860_v53 }
 0x679   :  { %v877_v39 = vmul.f32 %v875_v37, %v859_v22 }
 0x67b   :  { %1329 = vmatprep.mubr.msk.f32.mxu1 %vm377_vm10, %v877_v39 }
 0x67c   :  { %1330 = vmatmul.mubr.msk.f32.vlgmr.msra.gmra.mrb[8].mxu1 %vm377_vm10, %v878_v38 }
 0x67d   :  { %1415 = vmatpush3.bf16.msra.mxu1 %v1412_v0 }
 0x67e   :  { %1417 = vmatprep.subr.bf16.mxu1 %v1416_v1 }
 0x681   :  { %1419 = vmatpush3.bf16.msra.mxu1 %v1416_v1 }
 0x74f   :  { %v1331_v47 = vpop.f32.mrb[8].mxu1 }
 0x750   :  { %v968_v52 = vadd.f32 %v1331_v47, %v1217_v46  ;;  %v962_v54 = vpop.f32.mrb[9].mxu1 }
 0x751   :  { %v963_v55 = vadd.f32 %v1217_v46, %v962_v54 }
 0x752   :  { %v982_v56 = vmul.f32 %v979_v48, %v968_v52 }
 0x753   :  { %v981_v58 = vmul.f32 %v979_v48, %v963_v55 }
 0x754   :  { %v996_v61 = vadd.f32 %v994_v59, %v982_v56 }
 0x755   :  { %v995_v60 = vadd.f32 %v993_v57, %v981_v58 }
 0x757   :  { %1340 = vmatprep.mubr.msk.f32.mxu0 %vm377_vm10, %v995_v60 }
 0x758   :  { %1341 = vmatmul.mubr.msk.f32.vlgmr.msra.gmra.mrb[8].mxu0 %vm377_vm10, %v996_v61 }
 0x82b   :  { %v1342_v3 = vpop.f32.mrb[8].mxu0 }
 0x82c   :  { %v1086_v4 = vadd.f32 %v1342_v3, %v1220_v2  ;;  %v1080_v5 = vpop.f32.mrb[9].mxu0 }
 0x82d   :  { %v1081_v6 = vadd.f32 %v1220_v2, %v1080_v5 }
 0x82e   :  { %v1092_v7 = vmul.f32 0.01, %v1086_v4  ;;  %vm1090_vm15 = vcmp.gt.f32.partialorder %v1086_v4, 0.0 }
 0x82f   :  { %vm1089_vm0 = vcmp.gt.f32.partialorder %v1081_v6, 0.0  ;;  %v1091_v8 = vmul.f32 0.01, %v1081_v6 }
 0x830   :  { %v1094_v10 = vsel %vm1090_vm15, %v1086_v4, %v1092_v7 }
 0x831   :  { %v1093_v9 = vsel %vm1089_vm0, %v1081_v6, %v1091_v8 }
 0x832   :  { %1351 = vmatprep.mubr.msk.f32.mxu1 %vm377_vm10, %v1093_v9 }
 0x833   :  { %1352 = vmatmul.mubr.msk.f32.vlgmr.msra.gmra.mrb[10].mxu1 %vm377_vm10, %v1094_v10 }
 0x906   :  { %v1353_v12 = vpop.f32.mrb[10].mxu1 }
 0x907   :  { %v1184_v13 = vadd.f32 %v1353_v12, %v1223_v11  ;;  %v1178_v14 = vpop.f32.mrb[11].mxu1 }
 0x908   :  { %v1179_v15 = vadd.f32 %v1223_v11, %v1178_v14 }
 0x909   :  { %1188 = vst [vmem:[%s1765_s18 + $0x8] sm:$0xff] %v1184_v13 }
 0x90a   :  { %1187 = vst [vmem:[%s1765_s18] sm:$0xff] %v1179_v15 }

</bundles_post_ra>
